<compile_context>
chip_gen: v7x
topology: tpu7x:2x2x1
jax: 0.10.0
libtpu: 0.0.40
codegen_flags: <defaults>
</compile_context>

<pallas_src>
import jax
import jax.numpy as jnp
from jax.experimental import pallas as pl
from jax.experimental.pallas import tpu as pltpu

EPS = 1e-5
NEG_SLOPE = 0.01
K = 3  # kernel_size


def _ceil_to(x, m):
    return ((x + m - 1) // m) * m


def _make_fused_kernel(h, w, cin_p, c1, c1_p, col_len):
    """Fused (conv3x3 + InstanceNorm + LeakyReLU) x2 for one batch sample."""
    wp = w + 2
    hwp = h * wp                 # "H rows x WP cols" compute layout extent
    inv_n = 1.0 / float(h * w)

    def kernel(x_ref, w1_ref, w2_ref, o_ref, col_ref, a1_ref):
        # x_ref : (1, cin_p, SRC_LEN) bf16  zero-padded sample (row-major HP x WP,
        #         zero tail to SRC_LEN), channels zero-padded to cin_p.
        # w1_ref: (c1, 9*cin_p) bf16        w2_ref: (c2, 9*c1_p) bf16
        # o_ref : (1, c2, COL_LEN) f32      output in "H x WP (+pad)" layout
        # col_ref: (9*max(cin_p, c1_p), COL_LEN) bf16  im2col scratch (shared)
        # a1_ref: (c1_p, SRC_LEN) bf16      zero-padded stage-1 activation

        # Column-validity mask: columns >= hwp are alignment padding, and the
        # last (wp - w) columns of each row alias the zero-padding ring.
        col = jax.lax.broadcasted_iota(jnp.int32, (1, col_len), 1)
        valid01 = ((col < hwp) & ((col % wp) < w)).astype(jnp.float32)

        def build_im2col(src_tap, cp):
            # 9 shifted copies of the padded sample -> rows [t*cp, (t+1)*cp).
            for kh in range(K):
                for kw in range(K):
                    t = kh * K + kw
                    col_ref[t * cp:(t + 1) * cp, :] = src_tap(kh * wp + kw)

        def inorm_lrelu(y, mask_out):
            # InstanceNorm (biased var, two-pass, f32) + LeakyReLU(0.01).
            vm = jnp.broadcast_to(valid01, y.shape)      # hoisted, reused 3x
            mean = jnp.sum(y * vm, axis=1, keepdims=True) * inv_n
            d = (y - mean) * vm
            var = jnp.sum(d * d, axis=1, keepdims=True) * inv_n
            yn = (y - mean) * jax.lax.rsqrt(var + EPS)
            a = jnp.where(yn > 0, yn, NEG_SLOPE * yn)
            return a * vm if mask_out else a

        # ---- stage 1: conv1 + InstanceNorm + LeakyReLU (single MXU matmul) ----
        build_im2col(lambda off: x_ref[0, :, off:off + col_len], cin_p)
        y1 = jnp.dot(w1_ref[...], col_ref[0:K * K * cin_p, :],
                     preferred_element_type=jnp.float32)
        a1 = inorm_lrelu(y1, mask_out=True)              # junk cols forced to 0

        # ---- place stage-1 activation into a zero-padded bf16 image in VMEM ----
        # Flat offset (wp+1): interior pixel (r, c) -> padded position (r+1, c+1).
        # Masked junk columns land exactly on padding-ring positions (value 0).
        a1_ref[...] = jnp.zeros(a1_ref.shape, a1_ref.dtype)
        a1_ref[0:c1, wp + 1:wp + 1 + col_len] = a1.astype(jnp.bfloat16)

        # ---- stage 2: conv2 + InstanceNorm + LeakyReLU (single MXU matmul) ----
        build_im2col(lambda off: a1_ref[:, off:off + col_len], c1_p)
        y2 = jnp.dot(w2_ref[...], col_ref[0:K * K * c1_p, :],
                     preferred_element_type=jnp.float32)
        o_ref[0] = inorm_lrelu(y2, mask_out=False)

    return kernel


def _weight_matrix(w_oihw, cin_pad):
    """(O, I, 3, 3) f32 -> (O, 9*cin_pad) bf16, columns ordered tap-major /
    channel-minor to match the in-kernel im2col row layout (row = tap*cin_pad + c)."""
    o, i, kh, kw = w_oihw.shape
    wpd = jnp.pad(w_oihw, ((0, 0), (0, cin_pad - i), (0, 0), (0, 0)))
    return jnp.transpose(wpd, (0, 2, 3, 1)).reshape(o, kh * kw * cin_pad).astype(jnp.bfloat16)


@jax.jit
def unest_conv_block(x_nchw, w1_oihw, w2_oihw):
    """Full UNesTConvBlock forward (UnetBasicBlock, stride=1). NCHW in / NCHW out."""
    n, cin, h, w = x_nchw.shape
    c1 = w1_oihw.shape[0]
    c2 = w2_oihw.shape[0]
    hp, wp = h + 2, w + 2
    hwp, hpwp = h * wp, hp * wp

    col_len = _ceil_to(hwp, 128)                    # conv-output column extent (lane aligned)
    src_len = _ceil_to(2 * wp + 2 + col_len, 128)   # padded-source extent (covers all 9 taps)
    cin_p = _ceil_to(cin, 8)                        # sublane-aligned channel counts
    c1_p = _ceil_to(c1, 8)

    # Zero-pad (pad=1 spatial, channel pad to sublane multiple), flatten, zero tail.
    x_pad = jnp.pad(x_nchw, ((0, 0), (0, cin_p - cin), (1, 1), (1, 1)))
    x_src = jnp.pad(x_pad.reshape(n, cin_p, hpwp),
                    ((0, 0), (0, 0), (0, src_len - hpwp))).astype(jnp.bfloat16)

    w1_mat = _weight_matrix(w1_oihw, cin_p)         # (c1, 9*cin_p)
    w2_mat = _weight_matrix(w2_oihw, c1_p)          # (c2, 9*c1_p)

    flops = 2 * n * h * w * K * K * (cin * c1 + c1 * c2)
    bytes_accessed = (x_src.size * 2 + w1_mat.size * 2 + w2_mat.size * 2
                      + n * c2 * col_len * 4)
    cost = pl.CostEstimate(flops=flops, transcendentals=2 * n * (c1 + c2),
                           bytes_accessed=bytes_accessed)

    out_flat = pl.pallas_call(
        _make_fused_kernel(h, w, cin_p, c1, c1_p, col_len),
        out_shape=jax.ShapeDtypeStruct((n, c2, col_len), jnp.float32),
        grid=(n,),
        in_specs=[
            pl.BlockSpec((1, cin_p, src_len), lambda b: (b, 0, 0)),
            pl.BlockSpec((c1, K * K * cin_p), lambda b: (0, 0)),
            pl.BlockSpec((c2, K * K * c1_p), lambda b: (0, 0)),
        ],
        out_specs=pl.BlockSpec((1, c2, col_len), lambda b: (b, 0, 0)),
        scratch_shapes=[
            pltpu.VMEM((K * K * max(cin_p, c1_p), col_len), jnp.bfloat16),  # im2col
            pltpu.VMEM((c1_p, src_len), jnp.bfloat16),                      # padded a1
        ],
        compiler_params=pltpu.CompilerParams(
            dimension_semantics=("parallel",),      # one sample per TC on v7x
            vmem_limit_bytes=16 * 1024 * 1024,      # working set ~70 KB / sample
        ),
        cost_estimate=cost,
    )(x_src, w1_mat, w2_mat)

    # Strip alignment columns: COL_LEN -> hwp -> (h, wp) -> drop the pad cols.
    return out_flat[:, :, :hwp].reshape(n, c2, h, wp)[:, :, :, :w]


# ---------------------------------------------------------------------------
# Pure-JAX reference with matched MXU precision (bf16 operands, f32 accumulate)
# ---------------------------------------------------------------------------
def _ref_stage(x_nchw, w_oihw):
    xb = x_nchw.astype(jnp.bfloat16)
    wb = w_oihw.astype(jnp.bfloat16)
    y = jax.lax.conv_general_dilated(
        xb, wb, window_strides=(1, 1), padding=((1, 1), (1, 1)),
        dimension_numbers=("NCHW", "OIHW", "NCHW"),
        preferred_element_type=jnp.float32)
    mean = jnp.mean(y, axis=(2, 3), keepdims=True)
    var = jnp.mean((y - mean) ** 2, axis=(2, 3), keepdims=True)
    yn = (y - mean) * jax.lax.rsqrt(var + EPS)
    return jnp.where(yn > 0, yn, NEG_SLOPE * yn)


def _ref_block(x_nchw, w1, w2):
    return _ref_stage(_ref_stage(x_nchw, w1), w2)


if __name__ == "__main__":
    # Module config: spatial_dims=2, in_channels=4, out_channels=8,
    # kernel_size=3, stride=1, norm_name="instance", res_block=False.
    N, CIN, COUT, H, W = 2, 4, 8, 16, 16

    key = jax.random.PRNGKey(0)
    kx, kw1, kw2 = jax.random.split(key, 3)
    x = jax.random.normal(kx, (N, CIN, H, W), dtype=jnp.float32)
    w1 = jax.random.normal(kw1, (COUT, CIN, K, K), dtype=jnp.float32) * 0.1
    w2 = jax.random.normal(kw2, (COUT, COUT, K, K), dtype=jnp.float32) * 0.1

    out = jax.block_until_ready(unest_conv_block(x, w1, w2))
    ref = jax.block_until_ready(_ref_block(x, w1, w2))

    assert out.shape == (N, COUT, H, W), out.shape
    max_err = float(jnp.max(jnp.abs(out - ref)))
    assert jnp.allclose(out, ref, atol=1e-2, rtol=1e-2), max_err
    print("KERNEL_OK")
</pallas_src>

<mosaic_0001>
module attributes {stable_mosaic.version = 11 : i64} {
  func.func @kernel(%arg0: i32, %arg1: memref<1x8x512xbf16, #tpu.memory_space<vmem>>, %arg2: memref<8x72xbf16, #tpu.memory_space<vmem>>, %arg3: memref<8x72xbf16, #tpu.memory_space<vmem>>, %arg4: memref<1x8x384xf32, #tpu.memory_space<vmem>>, %arg5: memref<72x384xbf16, #tpu.memory_space<vmem>>, %arg6: memref<8x512xbf16, #tpu.memory_space<vmem>>) attributes {dimension_semantics = [#tpu.dimension_semantics<parallel>], iteration_bounds = array<i64: 2>, scalar_prefetch = 0 : i64, scratch_operands = 2 : i64, tpu.core_type = #tpu.core_type<tc>, window_params = [{transform_indices = @transform_0, window_bounds = array<i64: 1, 8, 512>}, {pipeline_mode = #tpu.pipeline_mode<synchronous>, transform_indices = @transform_1, window_bounds = array<i64: 8, 72>}, {pipeline_mode = #tpu.pipeline_mode<synchronous>, transform_indices = @transform_2, window_bounds = array<i64: 8, 72>}, {transform_indices = @transform_3, window_bounds = array<i64: 1, 8, 384>}]} {
    %0 = tpu.iota {dimensions = array<i32: 1>} : vector<1x384xi32>
    %c288_i32 = arith.constant 288 : i32
    %1 = vector.broadcast %c288_i32 : i32 to vector<1x384xi32>
    %2 = arith.cmpi slt, %0, %1 : vector<1x384xi32>
    %c18_i32 = arith.constant 18 : i32
    %c0_i32 = arith.constant 0 : i32
    %3 = arith.cmpi eq, %c18_i32, %c0_i32 : i32
    %c1_i32 = arith.constant 1 : i32
    %4 = arith.select %3, %c1_i32, %c18_i32 : i32
    %5 = vector.broadcast %4 : i32 to vector<1x384xi32>
    %6 = arith.remsi %0, %5 : vector<1x384xi32>
    %c0_i32_0 = arith.constant 0 : i32
    %7 = vector.broadcast %c0_i32_0 : i32 to vector<1x384xi32>
    %8 = arith.cmpi ne, %6, %7 : vector<1x384xi32>
    %c0_i32_1 = arith.constant 0 : i32
    %9 = vector.broadcast %c0_i32_1 : i32 to vector<1x384xi32>
    %10 = arith.cmpi slt, %6, %9 : vector<1x384xi32>
    %c0_i32_2 = arith.constant 0 : i32
    %11 = arith.cmpi slt, %4, %c0_i32_2 : i32
    %12 = vector.broadcast %11 : i1 to vector<1x384xi1>
    %13 = vector.broadcast %12 : vector<1x384xi1> to vector<1x384xi1>
    %14 = arith.xori %10, %13 : vector<1x384xi1>
    %15 = arith.andi %14, %8 : vector<1x384xi1>
    %16 = vector.broadcast %4 : i32 to vector<1x384xi32>
    %17 = arith.addi %6, %16 : vector<1x384xi32>
    %18 = arith.select %15, %17, %6 : vector<1x384xi1>, vector<1x384xi32>
    %c16_i32 = arith.constant 16 : i32
    %19 = vector.broadcast %c16_i32 : i32 to vector<1x384xi32>
    %20 = arith.cmpi slt, %18, %19 : vector<1x384xi32>
    %21 = arith.andi %2, %20 : vector<1x384xi1>
    %22 = arith.extui %21 : vector<1x384xi1> to vector<1x384xi32>
    %23 = arith.sitofp %22 : vector<1x384xi32> to vector<1x384xf32>
    %c0 = arith.constant 0 : index
    %c0_3 = arith.constant 0 : index
    %c0_4 = arith.constant 0 : index
    %24 = vector.load %arg1[%c0, %c0_3, %c0_4] : memref<1x8x512xbf16, #tpu.memory_space<vmem>>, vector<1x8x384xbf16>
    %25 = vector.shape_cast %24 : vector<1x8x384xbf16> to vector<8x384xbf16>
    %c0_5 = arith.constant 0 : index
    %c0_6 = arith.constant 0 : index
    %26 = vector.load %arg5[%c0_5, %c0_6] : memref<72x384xbf16, #tpu.memory_space<vmem>>, vector<8x384xbf16>
    tpu.vector_store %arg5[%c0_5, %c0_6], %25 {strides = array<i32>} : memref<72x384xbf16, #tpu.memory_space<vmem>>, vector<8x384xbf16>,
    %c0_7 = arith.constant 0 : index
    %c0_8 = arith.constant 0 : index
    %c1 = arith.constant 1 : index
    %27 = vector.load %arg1[%c0_7, %c0_8, %c1] : memref<1x8x512xbf16, #tpu.memory_space<vmem>>, vector<1x8x384xbf16>
    %28 = vector.shape_cast %27 : vector<1x8x384xbf16> to vector<8x384xbf16>
    %c8 = arith.constant 8 : index
    %c0_9 = arith.constant 0 : index
    %29 = vector.load %arg5[%c8, %c0_9] : memref<72x384xbf16, #tpu.memory_space<vmem>>, vector<8x384xbf16>
    tpu.vector_store %arg5[%c8, %c0_9], %28 {strides = array<i32>} : memref<72x384xbf16, #tpu.memory_space<vmem>>, vector<8x384xbf16>,
    %c0_10 = arith.constant 0 : index
    %c0_11 = arith.constant 0 : index
    %c2 = arith.constant 2 : index
    %30 = vector.load %arg1[%c0_10, %c0_11, %c2] : memref<1x8x512xbf16, #tpu.memory_space<vmem>>, vector<1x8x384xbf16>
    %31 = vector.shape_cast %30 : vector<1x8x384xbf16> to vector<8x384xbf16>
    %c16 = arith.constant 16 : index
    %c0_12 = arith.constant 0 : index
    %32 = vector.load %arg5[%c16, %c0_12] : memref<72x384xbf16, #tpu.memory_space<vmem>>, vector<8x384xbf16>
    tpu.vector_store %arg5[%c16, %c0_12], %31 {strides = array<i32>} : memref<72x384xbf16, #tpu.memory_space<vmem>>, vector<8x384xbf16>,
    %c0_13 = arith.constant 0 : index
    %c0_14 = arith.constant 0 : index
    %c18 = arith.constant 18 : index
    %33 = vector.load %arg1[%c0_13, %c0_14, %c18] : memref<1x8x512xbf16, #tpu.memory_space<vmem>>, vector<1x8x384xbf16>
    %34 = vector.shape_cast %33 : vector<1x8x384xbf16> to vector<8x384xbf16>
    %c24 = arith.constant 24 : index
    %c0_15 = arith.constant 0 : index
    %35 = vector.load %arg5[%c24, %c0_15] : memref<72x384xbf16, #tpu.memory_space<vmem>>, vector<8x384xbf16>
    tpu.vector_store %arg5[%c24, %c0_15], %34 {strides = array<i32>} : memref<72x384xbf16, #tpu.memory_space<vmem>>, vector<8x384xbf16>,
    %c0_16 = arith.constant 0 : index
    %c0_17 = arith.constant 0 : index
    %c19 = arith.constant 19 : index
    %36 = vector.load %arg1[%c0_16, %c0_17, %c19] : memref<1x8x512xbf16, #tpu.memory_space<vmem>>, vector<1x8x384xbf16>
    %37 = vector.shape_cast %36 : vector<1x8x384xbf16> to vector<8x384xbf16>
    %c32 = arith.constant 32 : index
    %c0_18 = arith.constant 0 : index
    %38 = vector.load %arg5[%c32, %c0_18] : memref<72x384xbf16, #tpu.memory_space<vmem>>, vector<8x384xbf16>
    tpu.vector_store %arg5[%c32, %c0_18], %37 {strides = array<i32>} : memref<72x384xbf16, #tpu.memory_space<vmem>>, vector<8x384xbf16>,
    %c0_19 = arith.constant 0 : index
    %c0_20 = arith.constant 0 : index
    %c20 = arith.constant 20 : index
    %39 = vector.load %arg1[%c0_19, %c0_20, %c20] : memref<1x8x512xbf16, #tpu.memory_space<vmem>>, vector<1x8x384xbf16>
    %40 = vector.shape_cast %39 : vector<1x8x384xbf16> to vector<8x384xbf16>
    %c40 = arith.constant 40 : index
    %c0_21 = arith.constant 0 : index
    %41 = vector.load %arg5[%c40, %c0_21] : memref<72x384xbf16, #tpu.memory_space<vmem>>, vector<8x384xbf16>
    tpu.vector_store %arg5[%c40, %c0_21], %40 {strides = array<i32>} : memref<72x384xbf16, #tpu.memory_space<vmem>>, vector<8x384xbf16>,
    %c0_22 = arith.constant 0 : index
    %c0_23 = arith.constant 0 : index
    %c36 = arith.constant 36 : index
    %42 = vector.load %arg1[%c0_22, %c0_23, %c36] : memref<1x8x512xbf16, #tpu.memory_space<vmem>>, vector<1x8x384xbf16>
    %43 = vector.shape_cast %42 : vector<1x8x384xbf16> to vector<8x384xbf16>
    %c48 = arith.constant 48 : index
    %c0_24 = arith.constant 0 : index
    %44 = vector.load %arg5[%c48, %c0_24] : memref<72x384xbf16, #tpu.memory_space<vmem>>, vector<8x384xbf16>
    tpu.vector_store %arg5[%c48, %c0_24], %43 {strides = array<i32>} : memref<72x384xbf16, #tpu.memory_space<vmem>>, vector<8x384xbf16>,
    %c0_25 = arith.constant 0 : index
    %c0_26 = arith.constant 0 : index
    %c37 = arith.constant 37 : index
    %45 = vector.load %arg1[%c0_25, %c0_26, %c37] : memref<1x8x512xbf16, #tpu.memory_space<vmem>>, vector<1x8x384xbf16>
    %46 = vector.shape_cast %45 : vector<1x8x384xbf16> to vector<8x384xbf16>
    %c56 = arith.constant 56 : index
    %c0_27 = arith.constant 0 : index
    %47 = vector.load %arg5[%c56, %c0_27] : memref<72x384xbf16, #tpu.memory_space<vmem>>, vector<8x384xbf16>
    tpu.vector_store %arg5[%c56, %c0_27], %46 {strides = array<i32>} : memref<72x384xbf16, #tpu.memory_space<vmem>>, vector<8x384xbf16>,
    %c0_28 = arith.constant 0 : index
    %c0_29 = arith.constant 0 : index
    %c38 = arith.constant 38 : index
    %48 = vector.load %arg1[%c0_28, %c0_29, %c38] : memref<1x8x512xbf16, #tpu.memory_space<vmem>>, vector<1x8x384xbf16>
    %49 = vector.shape_cast %48 : vector<1x8x384xbf16> to vector<8x384xbf16>
    %c64 = arith.constant 64 : index
    %c0_30 = arith.constant 0 : index
    %50 = vector.load %arg5[%c64, %c0_30] : memref<72x384xbf16, #tpu.memory_space<vmem>>, vector<8x384xbf16>
    tpu.vector_store %arg5[%c64, %c0_30], %49 {strides = array<i32>} : memref<72x384xbf16, #tpu.memory_space<vmem>>, vector<8x384xbf16>,
    %c0_31 = arith.constant 0 : index
    %c0_32 = arith.constant 0 : index
    %51 = vector.load %arg2[%c0_31, %c0_32] : memref<8x72xbf16, #tpu.memory_space<vmem>>, vector<8x72xbf16>
    %c0_33 = arith.constant 0 : index
    %c0_34 = arith.constant 0 : index
    %52 = vector.load %arg5[%c0_33, %c0_34] : memref<72x384xbf16, #tpu.memory_space<vmem>>, vector<72x384xbf16>
    %cst = arith.constant dense<0.000000e+00> : vector<8x384xf32>
    %53 = tpu.matmul %51, %52, %cst {dimension_numbers = #tpu.dot_dimension_numbers<[1], [0], [0], [1], [0, 0, 1, 1], [], []>} : vector<8x72xbf16>, vector<72x384xbf16>, vector<8x384xf32> -> vector<8x384xf32>
    %54 = vector.shape_cast %23 : vector<1x384xf32> to vector<1x384xf32>
    %55 = vector.broadcast %54 : vector<1x384xf32> to vector<8x384xf32>
    %56 = arith.mulf %53, %55 : vector<8x384xf32>
    %cst_35 = arith.constant dense<0.000000e+00> : vector<8xf32>
    %57 = vector.multi_reduction <add>, %56, %cst_35 [1] : vector<8x384xf32> to vector<8xf32>
    %58 = vector.shape_cast %57 : vector<8xf32> to vector<8x1xf32>
    %cst_36 = arith.constant 3.906250e-03 : f32
    %59 = vector.broadcast %cst_36 : f32 to vector<8x1xf32>
    %60 = arith.mulf %58, %59 : vector<8x1xf32>
    %61 = vector.broadcast %60 : vector<8x1xf32> to vector<8x384xf32>
    %62 = arith.subf %53, %61 : vector<8x384xf32>
    %63 = arith.mulf %62, %55 : vector<8x384xf32>
    %64 = arith.mulf %63, %63 : vector<8x384xf32>
    %cst_37 = arith.constant dense<0.000000e+00> : vector<8xf32>
    %65 = vector.multi_reduction <add>, %64, %cst_37 [1] : vector<8x384xf32> to vector<8xf32>
    %66 = vector.shape_cast %65 : vector<8xf32> to vector<8x1xf32>
    %cst_38 = arith.constant 3.906250e-03 : f32
    %67 = vector.broadcast %cst_38 : f32 to vector<8x1xf32>
    %68 = arith.mulf %66, %67 : vector<8x1xf32>
    %69 = vector.broadcast %60 : vector<8x1xf32> to vector<8x384xf32>
    %70 = arith.subf %53, %69 : vector<8x384xf32>
    %cst_39 = arith.constant 9.99999974E-6 : f32
    %71 = vector.broadcast %cst_39 : f32 to vector<8x1xf32>
    %72 = arith.addf %68, %71 : vector<8x1xf32>
    %73 = math.rsqrt %72 : vector<8x1xf32>
    %74 = vector.broadcast %73 : vector<8x1xf32> to vector<8x384xf32>
    %75 = arith.mulf %70, %74 : vector<8x384xf32>
    %cst_40 = arith.constant 0.000000e+00 : f32
    %76 = vector.broadcast %cst_40 : f32 to vector<8x384xf32>
    %77 = arith.cmpf ogt, %75, %76 : vector<8x384xf32>
    %cst_41 = arith.constant 0.00999999977 : f32
    %78 = vector.broadcast %cst_41 : f32 to vector<8x384xf32>
    %79 = arith.mulf %78, %75 : vector<8x384xf32>
    %80 = arith.select %77, %75, %79 : vector<8x384xi1>, vector<8x384xf32>
    %81 = arith.mulf %80, %55 : vector<8x384xf32>
    %cst_42 = arith.constant 0.000000e+00 : bf16
    %82 = vector.broadcast %cst_42 : bf16 to vector<8x512xbf16>
    %c0_43 = arith.constant 0 : index
    %c0_44 = arith.constant 0 : index
    %83 = vector.load %arg6[%c0_43, %c0_44] : memref<8x512xbf16, #tpu.memory_space<vmem>>, vector<8x512xbf16>
    tpu.vector_store %arg6[%c0_43, %c0_44], %82 {strides = array<i32>} : memref<8x512xbf16, #tpu.memory_space<vmem>>, vector<8x512xbf16>,
    %84 = arith.truncf %81 : vector<8x384xf32> to vector<8x384xbf16>
    %c0_45 = arith.constant 0 : index
    %c19_46 = arith.constant 19 : index
    %85 = vector.load %arg6[%c0_45, %c19_46] : memref<8x512xbf16, #tpu.memory_space<vmem>>, vector<8x384xbf16>
    tpu.vector_store %arg6[%c0_45, %c19_46], %84 {strides = array<i32>} : memref<8x512xbf16, #tpu.memory_space<vmem>>, vector<8x384xbf16>,
    %c0_47 = arith.constant 0 : index
    %c0_48 = arith.constant 0 : index
    %86 = vector.load %arg6[%c0_47, %c0_48] : memref<8x512xbf16, #tpu.memory_space<vmem>>, vector<8x384xbf16>
    %c0_49 = arith.constant 0 : index
    %c0_50 = arith.constant 0 : index
    %87 = vector.load %arg5[%c0_49, %c0_50] : memref<72x384xbf16, #tpu.memory_space<vmem>>, vector<8x384xbf16>
    tpu.vector_store %arg5[%c0_49, %c0_50], %86 {strides = array<i32>} : memref<72x384xbf16, #tpu.memory_space<vmem>>, vector<8x384xbf16>,
    %c0_51 = arith.constant 0 : index
    %c1_52 = arith.constant 1 : index
    %88 = vector.load %arg6[%c0_51, %c1_52] : memref<8x512xbf16, #tpu.memory_space<vmem>>, vector<8x384xbf16>
    %c8_53 = arith.constant 8 : index
    %c0_54 = arith.constant 0 : index
    %89 = vector.load %arg5[%c8_53, %c0_54] : memref<72x384xbf16, #tpu.memory_space<vmem>>, vector<8x384xbf16>
    tpu.vector_store %arg5[%c8_53, %c0_54], %88 {strides = array<i32>} : memref<72x384xbf16, #tpu.memory_space<vmem>>, vector<8x384xbf16>,
    %c0_55 = arith.constant 0 : index
    %c2_56 = arith.constant 2 : index
    %90 = vector.load %arg6[%c0_55, %c2_56] : memref<8x512xbf16, #tpu.memory_space<vmem>>, vector<8x384xbf16>
    %c16_57 = arith.constant 16 : index
    %c0_58 = arith.constant 0 : index
    %91 = vector.load %arg5[%c16_57, %c0_58] : memref<72x384xbf16, #tpu.memory_space<vmem>>, vector<8x384xbf16>
    tpu.vector_store %arg5[%c16_57, %c0_58], %90 {strides = array<i32>} : memref<72x384xbf16, #tpu.memory_space<vmem>>, vector<8x384xbf16>,
    %c0_59 = arith.constant 0 : index
    %c18_60 = arith.constant 18 : index
    %92 = vector.load %arg6[%c0_59, %c18_60] : memref<8x512xbf16, #tpu.memory_space<vmem>>, vector<8x384xbf16>
    %c24_61 = arith.constant 24 : index
    %c0_62 = arith.constant 0 : index
    %93 = vector.load %arg5[%c24_61, %c0_62] : memref<72x384xbf16, #tpu.memory_space<vmem>>, vector<8x384xbf16>
    tpu.vector_store %arg5[%c24_61, %c0_62], %92 {strides = array<i32>} : memref<72x384xbf16, #tpu.memory_space<vmem>>, vector<8x384xbf16>,
    %c0_63 = arith.constant 0 : index
    %c19_64 = arith.constant 19 : index
    %94 = vector.load %arg6[%c0_63, %c19_64] : memref<8x512xbf16, #tpu.memory_space<vmem>>, vector<8x384xbf16>
    %c32_65 = arith.constant 32 : index
    %c0_66 = arith.constant 0 : index
    %95 = vector.load %arg5[%c32_65, %c0_66] : memref<72x384xbf16, #tpu.memory_space<vmem>>, vector<8x384xbf16>
    tpu.vector_store %arg5[%c32_65, %c0_66], %94 {strides = array<i32>} : memref<72x384xbf16, #tpu.memory_space<vmem>>, vector<8x384xbf16>,
    %c0_67 = arith.constant 0 : index
    %c20_68 = arith.constant 20 : index
    %96 = vector.load %arg6[%c0_67, %c20_68] : memref<8x512xbf16, #tpu.memory_space<vmem>>, vector<8x384xbf16>
    %c40_69 = arith.constant 40 : index
    %c0_70 = arith.constant 0 : index
    %97 = vector.load %arg5[%c40_69, %c0_70] : memref<72x384xbf16, #tpu.memory_space<vmem>>, vector<8x384xbf16>
    tpu.vector_store %arg5[%c40_69, %c0_70], %96 {strides = array<i32>} : memref<72x384xbf16, #tpu.memory_space<vmem>>, vector<8x384xbf16>,
    %c0_71 = arith.constant 0 : index
    %c36_72 = arith.constant 36 : index
    %98 = vector.load %arg6[%c0_71, %c36_72] : memref<8x512xbf16, #tpu.memory_space<vmem>>, vector<8x384xbf16>
    %c48_73 = arith.constant 48 : index
    %c0_74 = arith.constant 0 : index
    %99 = vector.load %arg5[%c48_73, %c0_74] : memref<72x384xbf16, #tpu.memory_space<vmem>>, vector<8x384xbf16>
    tpu.vector_store %arg5[%c48_73, %c0_74], %98 {strides = array<i32>} : memref<72x384xbf16, #tpu.memory_space<vmem>>, vector<8x384xbf16>,
    %c0_75 = arith.constant 0 : index
    %c37_76 = arith.constant 37 : index
    %100 = vector.load %arg6[%c0_75, %c37_76] : memref<8x512xbf16, #tpu.memory_space<vmem>>, vector<8x384xbf16>
    %c56_77 = arith.constant 56 : index
    %c0_78 = arith.constant 0 : index
    %101 = vector.load %arg5[%c56_77, %c0_78] : memref<72x384xbf16, #tpu.memory_space<vmem>>, vector<8x384xbf16>
    tpu.vector_store %arg5[%c56_77, %c0_78], %100 {strides = array<i32>} : memref<72x384xbf16, #tpu.memory_space<vmem>>, vector<8x384xbf16>,
    %c0_79 = arith.constant 0 : index
    %c38_80 = arith.constant 38 : index
    %102 = vector.load %arg6[%c0_79, %c38_80] : memref<8x512xbf16, #tpu.memory_space<vmem>>, vector<8x384xbf16>
    %c64_81 = arith.constant 64 : index
    %c0_82 = arith.constant 0 : index
    %103 = vector.load %arg5[%c64_81, %c0_82] : memref<72x384xbf16, #tpu.memory_space<vmem>>, vector<8x384xbf16>
    tpu.vector_store %arg5[%c64_81, %c0_82], %102 {strides = array<i32>} : memref<72x384xbf16, #tpu.memory_space<vmem>>, vector<8x384xbf16>,
    %c0_83 = arith.constant 0 : index
    %c0_84 = arith.constant 0 : index
    %104 = vector.load %arg3[%c0_83, %c0_84] : memref<8x72xbf16, #tpu.memory_space<vmem>>, vector<8x72xbf16>
    %c0_85 = arith.constant 0 : index
    %c0_86 = arith.constant 0 : index
    %105 = vector.load %arg5[%c0_85, %c0_86] : memref<72x384xbf16, #tpu.memory_space<vmem>>, vector<72x384xbf16>
    %cst_87 = arith.constant dense<0.000000e+00> : vector<8x384xf32>
    %106 = tpu.matmul %104, %105, %cst_87 {dimension_numbers = #tpu.dot_dimension_numbers<[1], [0], [0], [1], [0, 0, 1, 1], [], []>} : vector<8x72xbf16>, vector<72x384xbf16>, vector<8x384xf32> -> vector<8x384xf32>
    %107 = vector.shape_cast %23 : vector<1x384xf32> to vector<1x384xf32>
    %108 = vector.broadcast %107 : vector<1x384xf32> to vector<8x384xf32>
    %109 = arith.mulf %106, %108 : vector<8x384xf32>
    %cst_88 = arith.constant dense<0.000000e+00> : vector<8xf32>
    %110 = vector.multi_reduction <add>, %109, %cst_88 [1] : vector<8x384xf32> to vector<8xf32>
    %111 = vector.shape_cast %110 : vector<8xf32> to vector<8x1xf32>
    %cst_89 = arith.constant 3.906250e-03 : f32
    %112 = vector.broadcast %cst_89 : f32 to vector<8x1xf32>
    %113 = arith.mulf %111, %112 : vector<8x1xf32>
    %114 = vector.broadcast %113 : vector<8x1xf32> to vector<8x384xf32>
    %115 = arith.subf %106, %114 : vector<8x384xf32>
    %116 = arith.mulf %115, %108 : vector<8x384xf32>
    %117 = arith.mulf %116, %116 : vector<8x384xf32>
    %cst_90 = arith.constant dense<0.000000e+00> : vector<8xf32>
    %118 = vector.multi_reduction <add>, %117, %cst_90 [1] : vector<8x384xf32> to vector<8xf32>
    %119 = vector.shape_cast %118 : vector<8xf32> to vector<8x1xf32>
    %cst_91 = arith.constant 3.906250e-03 : f32
    %120 = vector.broadcast %cst_91 : f32 to vector<8x1xf32>
    %121 = arith.mulf %119, %120 : vector<8x1xf32>
    %122 = vector.broadcast %113 : vector<8x1xf32> to vector<8x384xf32>
    %123 = arith.subf %106, %122 : vector<8x384xf32>
    %cst_92 = arith.constant 9.99999974E-6 : f32
    %124 = vector.broadcast %cst_92 : f32 to vector<8x1xf32>
    %125 = arith.addf %121, %124 : vector<8x1xf32>
    %126 = math.rsqrt %125 : vector<8x1xf32>
    %127 = vector.broadcast %126 : vector<8x1xf32> to vector<8x384xf32>
    %128 = arith.mulf %123, %127 : vector<8x384xf32>
    %cst_93 = arith.constant 0.000000e+00 : f32
    %129 = vector.broadcast %cst_93 : f32 to vector<8x384xf32>
    %130 = arith.cmpf ogt, %128, %129 : vector<8x384xf32>
    %cst_94 = arith.constant 0.00999999977 : f32
    %131 = vector.broadcast %cst_94 : f32 to vector<8x384xf32>
    %132 = arith.mulf %131, %128 : vector<8x384xf32>
    %133 = arith.select %130, %128, %132 : vector<8x384xi1>, vector<8x384xf32>
    %c0_95 = arith.constant 0 : index
    %c0_96 = arith.constant 0 : index
    %c0_97 = arith.constant 0 : index
    %134 = vector.load %arg4[%c0_95, %c0_96, %c0_97] : memref<1x8x384xf32, #tpu.memory_space<vmem>>, vector<1x8x384xf32>
    %135 = vector.shape_cast %134 : vector<1x8x384xf32> to vector<8x384xf32>
    %136 = vector.shape_cast %133 : vector<8x384xf32> to vector<1x8x384xf32>
    tpu.vector_store %arg4[%c0_95, %c0_96, %c0_97], %136 {strides = array<i32>} : memref<1x8x384xf32, #tpu.memory_space<vmem>>, vector<1x8x384xf32>,
    return
  }
  func.func @transform_0(%arg0: i32) -> (i32, i32, i32) {
    %c0_i32 = arith.constant 0 : i32
    %c0_i32_0 = arith.constant 0 : i32
    %c0_i32_1 = arith.constant 0 : i32
    return %arg0, %c0_i32, %c0_i32_0 : i32, i32, i32
  }
  func.func @transform_1(%arg0: i32) -> (i32, i32) {
    %c0_i32 = arith.constant 0 : i32
    %c0_i32_0 = arith.constant 0 : i32
    %c0_i32_1 = arith.constant 0 : i32
    return %c0_i32, %c0_i32_0 : i32, i32
  }
  func.func @transform_2(%arg0: i32) -> (i32, i32) {
    %c0_i32 = arith.constant 0 : i32
    %c0_i32_0 = arith.constant 0 : i32
    %c0_i32_1 = arith.constant 0 : i32
    return %c0_i32, %c0_i32_0 : i32, i32
  }
  func.func @transform_3(%arg0: i32) -> (i32, i32, i32) {
    %c0_i32 = arith.constant 0 : i32
    %c0_i32_0 = arith.constant 0 : i32
    %c0_i32_1 = arith.constant 0 : i32
    return %arg0, %c0_i32, %c0_i32_0 : i32, i32, i32
  }
}

</mosaic_0001>

<bundles_post_ra>
// kernel: unest_conv_block.1
= control target key start
LH: loop header
LB: loop body
LE: loop exit
PB: predicated region body
PF: predicated region fallthrough
CT: control target
= control target key end

     0   :  { %s1238_s12 = smov 0   ;;  %s1423_s0 = inlined_call_operand.vmem [shape: bf16[2,8,512], index: 0, kind: input, shape index: {}]   ;;  %s1424_s1 = inlined_call_operand.vmem [shape: bf16[8,72], index: 1, kind: input, shape index: {}]   ;;  %s1425_s2 = inlined_call_operand.vmem [shape: bf16[8,72], index: 2, kind: input, shape index: {}]   ;;  %s1426_s3 = inlined_call_operand.vmem [shape: f32[2,8,384], index: 3, kind: output, shape index: {}]  }
   0x1 LB: > { %s1063_s13 = sadd.s32 4294967295, %s1204_s12   ;;  %p1067_p0 = scmp.ge.s32.totalorder %s1204_s12, 1  ;;  %s1204_s12 = sphi %s1238_s12, %s13_s12  }
   0x2   : > { %p137_p1 = scmp.lt.s32.totalorder %s1204_s12, 3 }
   0x4   : > { %p138_p2 = pnand %p1067_p0, %p137_p1 }
   0x5   : > { %p161_p3 = scmp.lt.s32.totalorder (!%p138_p2), %s1063_s13, 1  ;;  %s1206_s18 = smov (!%p138_p2), 126   ;;  %v1208_v3 = vmov (!%p138_p2), 0.0   ;;  %v1214_v4 = vmov (!%p138_p2), 0   ;;  %vm1216_vm0 = vmmov (!%p138_p2), 0   ;;  %vm253_vm1 = vcmask (!%p138_p2), 1043456  }
   0x6   : > { %141 = sbr.rel (%p138_p2) target bundleno = 1532 (0x5fc), region = 32  ;;  %s1207_s19 = smov (!%p138_p2), 127   ;;  %1129 = vmatprep.subr.bf16.mxu1 (!%p138_p2), %v1208_v3  ;;  %614 = vst [vmem:[#allocation3 + $0x8] sm:$0xff] (!%p138_p2), %v1214_v4  ;;  %613 = vst [vmem:[#allocation3] sm:$0xff] (!%p138_p2), %v1214_v4  ;;  %525 = vmatprep.mubr.bf16.mxu0 (!%p138_p2), %v1214_v4  ;;  %vm273_vm2 = vcmask (!%p138_p2), 1031168   ;;  %vm255_vm3 = vcmask (!%p138_p2), 1039360  }
   0x7   : > { %s1209_s20 = smov (!%p138_p2), 110   ;;  %s1210_s21 = smov (!%p138_p2), 109   ;;  %1139 = vmatprep.mubr.msk.bf16.mxu1 (!%p138_p2), %vm1216_vm0, %v1208_v3  ;;  %vm1433_vm4 = vcmask (!%p138_p2), 900096   ;;  %vm1432_vm5 = vcmask (!%p138_p2), 891904   ;;  %vm1431_vm6 = vcmask (!%p138_p2), 883712   ;;  %vm1430_vm7 = vcmask (!%p138_p2), 752640  }
   0x8   : > { %s1211_s22 = smov (!%p138_p2), 108   ;;  %s1212_s23 = smov (!%p138_p2), 92   ;;  %vm1429_vm8 = vcmask (!%p138_p2), 744448   ;;  %vm1428_vm9 = vcmask (!%p138_p2), 736256   ;;  %vm1427_vm10 = vcmask (!%p138_p2), 588800  }
   0x9   : > { %s1213_s24 = smov (!%p138_p2), 91   ;;  %s1215_s25 = smov (!%p138_p2), 90  }
   0xa   : > { %s1217_s28 = smov (!%p138_p2), 19  }
   0xd   : > { %s1449_s13 = smov (!%p161_p3, %s1063_s13), 1 }
   0xe   : > { %s1114_s14 = sshll.u32 %s1449_s13, 4  ;;  %s1157_s4 = smul.u32 24, %s1449_s13 }
   0xf   : > { %s165_s17 = scalar_lea.vmem %s1423_s0, %s1114_s14 }
  0x10   : > { %v1252_v0 = vld [vmem:[%s165_s17] sm:$0xff]  ;;  %v240_v1 = vld [vmem:[%s165_s17 + $0x8] sm:$0xf]  ;;  %s170_s7 = scalar_lea.vmem %s1426_s3, %s1157_s4 }
  0x11   : > { %266 = vrot.lane.b32.xlu1 %v1252_v0, %s1206_s18  ;;  %247 = vrot.lane.b32.xlu0 %v1252_v0, %s1207_s19  ;;  %242 = vst [vmem:[#allocation2 + $0x8] sm:$0xf] %v240_v1  ;;  %v263_v2 = vld [vmem:[%s165_s17 + $0x8] sm:$0xff] }
  0x15   : > { %268 = vrot.lane.b32.xlu1 %v263_v2, %s1206_s18  ;;  %249 = vrot.lane.b32.xlu0 %v263_v2, %s1207_s19 }
  0x19   : > { %286 = vrot.lane.b32.xlu1 %v263_v2, %s1209_s20  ;;  %284 = vrot.lane.b32.xlu0 %v1252_v0, %s1209_s20 }
  0x1d   : > { %304 = vrot.lane.b32.xlu1 %v263_v2, %s1210_s21  ;;  %302 = vrot.lane.b32.xlu0 %v1252_v0, %s1210_s21 }
  0x21   : > { %322 = vrot.lane.b32.xlu1 %v263_v2, %s1211_s22  ;;  %320 = vrot.lane.b32.xlu0 %v1252_v0, %s1211_s22 }
  0x25   : > { %340 = vrot.lane.b32.xlu1 %v263_v2, %s1212_s23  ;;  %338 = vrot.lane.b32.xlu0 %v1252_v0, %s1212_s23 }
  0x29   : > { %358 = vrot.lane.b32.xlu1 %v263_v2, %s1213_s24  ;;  %356 = vrot.lane.b32.xlu0 %v1252_v0, %s1213_s24 }
  0x2d   : > { %376 = vrot.lane.b32.xlu1 %v263_v2, %s1215_s25  ;;  %374 = vrot.lane.b32.xlu0 %v1252_v0, %s1215_s25 }
  0x83   : > { %v267_v5 = vpop.permute.xlu1 %266  ;;  %v248_v6 = vpop.permute.xlu0 %247 }
  0x84   : > { %v251_v7 = vrot.slane %v248_v6, 4  ;;  %v270_v12 = vrot.slane %v267_v5, 4 }
  0x87   : > { %v269_v8 = vpop.permute.xlu1 %268  ;;  %v250_v9 = vpop.permute.xlu0 %249 }
  0x88   : > { %v271_v10 = vrot.slane %v269_v8, 4  ;;  %v252_v11 = vrot.slane %v250_v9, 4 }
  0x8a   : > { %v275_v13 = vsel %vm273_vm2, %v269_v8, %v271_v10  ;;  %v254_v14 = vsel %vm253_vm1, %v251_v7, %v252_v11  ;;  %v257_v15 = vsel %vm255_vm3, %v250_v9, %v252_v11  ;;  %v272_v16 = vsel %vm253_vm1, %v270_v12, %v271_v10 }
  0x8b   : > { %279 = vst [vmem:[#allocation2 + $0x20] sm:$0xf] %v275_v13  ;;  %v256_v17 = vsel %vm255_vm3, %v248_v6, %v254_v14  ;;  %261 = vst [vmem:[#allocation2 + $0x14] sm:$0xf] %v257_v15  ;;  %v287_v18 = vpop.permute.xlu1 %286  ;;  %v285_v19 = vpop.permute.xlu0 %284  ;;  %v274_v26 = vsel %vm273_vm2, %v267_v5, %v272_v16  ;;  %v388_v14 = vld [vmem:[%s1424_s1] sm:$0xf] }
  0x8c   : > { %v289_v20 = vrot.slane %v287_v18, 4  ;;  %v288_v21 = vrot.slane %v285_v19, 4  ;;  %v1075_v22 = vcombine.high %v1252_v0, %v256_v17  ;;  %v1074_v23 = vcombine.low %v1252_v0, %v256_v17 }
  0x8d   : > { %v172_v17 = vlaneseq }
  0x8e   : > { %v293_v24 = vsel %vm1433_vm4, %v287_v18, %v289_v20  ;;  %v290_v25 = vsel %vm253_vm1, %v288_v21, %v289_v20  ;;  %493 = vmatprep.subr.bf16.mxu0 %v1075_v22 }
  0x8f   : > { %297 = vst [vmem:[#allocation2 + $0x2c] sm:$0xf] %v293_v24  ;;  %v292_v27 = vsel %vm1433_vm4, %v285_v19, %v290_v25  ;;  %v305_v28 = vpop.permute.xlu1 %304  ;;  %v303_v29 = vpop.permute.xlu0 %302  ;;  %494 = vmatpush1.bf16.msra.mxu0 %v1074_v23  ;;  %v173_v18 = vand.u32 127, %v172_v17 }
  0x90   : > { %v307_v30 = vrot.slane %v305_v28, 4  ;;  %v306_v31 = vrot.slane %v303_v29, 4  ;;  %v1078_v32 = vcombine.high %v274_v26, %v292_v27  ;;  %v1077_v33 = vcombine.low %v274_v26, %v292_v27 }
  0x91   : > { %v174_v19 = vadd.s32 128, %v173_v18  ;;  %v175_v20 = vadd.s32 256, %v173_v18  ;;  %v1326_v21 = vmul.u32.u64.low 3817748708, %v173_v18  ;;  %v1327_v22 = vmul.u32.u64.high 3817748708, %v173_v18, %v1326_v21 }
  0x92   : > { %v311_v34 = vsel %vm1432_vm5, %v305_v28, %v307_v30  ;;  %v1184_v35 = vld [vmem:[#allocation2 + $0x8] ss:$12 sps:$4 sm:$0xff]   ;;  %495 = vmatprep.subr.bf16.mxu0 %v1078_v32  ;;  %v308_v38 = vsel %vm253_vm1, %v306_v31, %v307_v30 }
  0x93   : > { %315 = vst [vmem:[#allocation2 + $0x38] sm:$0xf] %v311_v34  ;;  %v323_v36 = vpop.permute.xlu1 %322  ;;  %v321_v37 = vpop.permute.xlu0 %320  ;;  %496 = vmatpush1.bf16.msra.mxu0 %v1077_v33  ;;  %1130 = vmatpush3.bf16.msra.mxu1 %v1184_v35  ;;  %v310_v44 = vsel %vm1432_vm5, %v303_v29, %v308_v38  ;;  %v1329_v23 = vmul.u32.u64.low 3817748708, %v174_v19  ;;  %v1330_v24 = vmul.u32.u64.high 3817748708, %v174_v19, %v1329_v23  ;;  %v185_v26 = vshrl.u32 %v1327_v22, 4 }
  0x94   : > { %v325_v39 = vrot.slane %v323_v36, 4  ;;  %v324_v40 = vrot.slane %v321_v37, 4  ;;  %1131 = vmatprep.subr.bf16.mxu1 %v1208_v3  ;;  %vm178_vm5 = vcmp.lt.s32.totalorder %v175_v20, 288 }
  0x95   : > { %v196_v27 = vshrl.u32 %v1330_v24, 4  ;;  %v186_v29 = vmul.u32 18, %v185_v26 }
  0x96   : > { %v329_v41 = vsel %vm1431_vm6, %v323_v36, %v325_v39  ;;  %v326_v42 = vsel %vm253_vm1, %v324_v40, %v325_v39  ;;  %v1185_v43 = vld [vmem:[#allocation2 + $0x20] ss:$12 sps:$4 sm:$0xff]  }
  0x97   : > { %333 = vst [vmem:[#allocation2 + $0x44] sm:$0xf] %v329_v41  ;;  %v328_v45 = vsel %vm1431_vm6, %v321_v37, %v326_v42  ;;  %v341_v46 = vpop.permute.xlu1 %340  ;;  %v339_v47 = vpop.permute.xlu0 %338  ;;  %1132 = vmatpush3.bf16.msra.mxu1 %v1185_v43  ;;  %v197_v30 = vmul.u32 18, %v196_v27  ;;  %v187_v32 = vsub.s32 %v173_v18, %v186_v29 }
  0x98   : > { %v343_v48 = vrot.slane %v341_v46, 4  ;;  %v342_v49 = vrot.slane %v339_v47, 4  ;;  %v1081_v50 = vcombine.high %v310_v44, %v328_v45  ;;  %v1080_v51 = vcombine.low %v310_v44, %v328_v45  ;;  %1133 = vmatprep.subr.bf16.mxu1 %v1208_v3 }
  0x99   : > { %v198_v33 = vsub.s32 %v174_v19, %v197_v30  ;;  %vm212_vm11 = vcmp.ne.s32.totalorder %v187_v32, 0  ;;  %vm215_vm12 = vcmp.lt.s32.totalorder %v187_v32, 0  ;;  %v221_v35 = vadd.s32 18, %v187_v32 }
  0x9a   : > { %v347_v52 = vsel %vm1430_vm7, %v341_v46, %v343_v48  ;;  %497 = vmatprep.subr.bf16.mxu0 %v1081_v50  ;;  %v344_v55 = vsel %vm253_vm1, %v342_v49, %v343_v48  ;;  %vm218_vm15 = vmand %vm215_vm12, %vm212_vm11 }
  0x9b   : > { %351 = vst [vmem:[#allocation2 + $0x50] sm:$0xf] %v347_v52  ;;  %v359_v53 = vpop.permute.xlu1 %358  ;;  %v357_v54 = vpop.permute.xlu0 %356  ;;  %498 = vmatpush1.bf16.msra.mxu0 %v1080_v51  ;;  %v346_v61 = vsel %vm1430_vm7, %v339_v47, %v344_v55  ;;  %vm213_vm13 = vcmp.ne.s32.totalorder %v198_v33, 0  ;;  %vm216_vm14 = vcmp.lt.s32.totalorder %v198_v33, 0  ;;  %v222_v36 = vadd.s32 18, %v198_v33 }
  0x9c   : > { %v361_v56 = vrot.slane %v359_v53, 4  ;;  %v360_v57 = vrot.slane %v357_v54, 4  ;;  %v224_v38 = vsel %vm218_vm15, %v221_v35, %v187_v32 }
  0x9d   : > { %vm227_vm7 = vcmp.lt.s32.totalorder %v224_v38, 16 }
  0x9e   : > { %v365_v58 = vsel %vm1429_vm8, %v359_v53, %v361_v56  ;;  %v362_v59 = vsel %vm253_vm1, %v360_v57, %v361_v56  ;;  %v1186_v60 = vld [vmem:[#allocation2 + $0x38] ss:$12 sps:$4 sm:$0xff]   ;;  %v1339_v41 = vsel %vm227_vm7, 1.0, %v1208_v3  ;;  %vm638_vm7 = vcmask 1043608  }
  0x9f   : > { %369 = vst [vmem:[#allocation2 + $0x5c] sm:$0xf] %v365_v58  ;;  %v364_v62 = vsel %vm1429_vm8, %v357_v54, %v362_v59  ;;  %v377_v63 = vpop.permute.xlu1 %376  ;;  %v375_v0 = vpop.permute.xlu0 %374  ;;  %1134 = vmatpush3.bf16.msra.mxu1 %v1186_v60 }
  0xa0   : > { %v379_v1 = vrot.slane %v377_v63, 4  ;;  %v378_v2 = vrot.slane %v375_v0, 4  ;;  %v1084_v5 = vcombine.high %v346_v61, %v364_v62  ;;  %v1083_v6 = vcombine.low %v346_v61, %v364_v62  ;;  %1135 = vmatprep.subr.bf16.mxu1 %v1208_v3 }
  0xa2   : > { %v383_v7 = vsel %vm1428_vm9, %v377_v63, %v379_v1  ;;  %v380_v8 = vsel %vm253_vm1, %v378_v2, %v379_v1  ;;  %499 = vmatprep.subr.bf16.mxu0 %v1084_v5 }
  0xa3   : > { %387 = vst [vmem:[#allocation2 + $0x68] sm:$0xf] %v383_v7  ;;  %v382_v9 = vsel %vm1428_vm9, %v375_v0, %v380_v8  ;;  %500 = vmatpush1.bf16.msra.mxu0 %v1083_v6  ;;  %vm219_vm9 = vmand %vm216_vm14, %vm213_vm13 }
  0xa4   : > { %v1087_v10 = vcombine.high %v382_v9, %v382_v9  ;;  %v1086_v11 = vcombine.low %v382_v9, %v382_v9  ;;  %v225_v39 = vsel %vm219_vm9, %v222_v36, %v198_v33  ;;  %vm642_vm9 = vcmask 154628  }
  0xa5   : > { %vm228_vm6 = vcmp.lt.s32.totalorder %v225_v39, 16  ;;  %vm643_vm13 = vmor %vm642_vm9, %vm253_vm1 }
  0xa6   : > { %v1187_v12 = vld [vmem:[#allocation2 + $0x50] ss:$12 sps:$4 sm:$0xff]   ;;  %1089 = vmatprep.subr.msk.bf16.mxu0 %vm253_vm1, %v1087_v10  ;;  %v485_v13 = vsel %vm253_vm1, %v1086_v11, 0  ;;  %v1342_v42 = vsel %vm228_vm6, 1.0, %v1208_v3 }
  0xa7   : > { %502 = vmatpush1.bf16.msra.mxu0 %v485_v13  ;;  %1136 = vmatpush3.bf16.msra.mxu1 %v1187_v12 }
  0xa8   : > { %1137 = vmatprep.subr.bf16.mxu1 %v1208_v3 }
  0xaa   : > { %v1188_v15 = vld [vmem:[#allocation2 + $0x68] ss:$0 sps:$4 sm:$0xff]   ;;  %1090 = vmatmul.mubr.msk.bf16.vlgmr.msra.gmra.mrb[0].mxu0 %vm1427_vm10, %v388_v14 }
  0xab   : > { %920 = vmatprep.mubr.bf16.mxu0 %v1214_v4  ;;  %v491_v16 = vsel %vm253_vm1, %v1188_v15, 0  ;;  %v1332_v4 = vmul.u32.u64.low 3817748708, %v175_v20  ;;  %v1333_v25 = vmul.u32.u64.high 3817748708, %v175_v20, %v1332_v4 }
  0xac   : > { %1138 = vmatpush3.bf16.msra.mxu1 %v491_v16 }
  0xad   : > { %1143 = vmatprep.subr.bf16.mxu1 %v1208_v3  ;;  %v207_v28 = vshrl.u32 %v1333_v25, 4 }
  0xaf   : > { %1140 = vmatmul.mubr.msk.bf16.vlgmr.msra.gmra.mrb[0].mxu1 %vm1427_vm10, %v388_v14  ;;  %v208_v31 = vmul.u32 18, %v207_v28 }
  0xb0   : > { %1153 = vmatprep.mubr.msk.bf16.mxu1 %vm1216_vm0, %v1208_v3 }
  0xb1   : > { %v209_v34 = vsub.s32 %v175_v20, %v208_v31 }
  0xb3   : > { %vm214_vm0 = vcmp.ne.s32.totalorder %v209_v34, 0  ;;  %vm217_vm10 = vcmp.lt.s32.totalorder %v209_v34, 0  ;;  %v223_v37 = vadd.s32 18, %v209_v34 }
  0xb4   : > { %vm220_vm8 = vmand %vm217_vm10, %vm214_vm0  ;;  %vm632_vm10 = vcmask 154624   ;;  %vm1438_vm0 = vcmask 883712  }
  0xb5   : > { %v226_v40 = vsel %vm220_vm8, %v223_v37, %v209_v34  ;;  %vm639_vm8 = vcmask 1047556  }
  0xb6   : > { %vm229_vm4 = vcmp.lt.s32.totalorder %v226_v40, 16  ;;  %vm640_vm12 = vmor %vm639_vm8, %vm638_vm7  ;;  %vm1444_vm8 = vcmask 736256  }
  0xb7   : > { %vm232_vm11 = vmand %vm178_vm5, %vm229_vm4 }
  0xb8   : > { %v1347_v49 = vsel %vm232_vm11, 1.0, %v1208_v3  ;;  %vm1439_vm11 = vmmov %vm1438_vm0 }
  0xb9   : > { %vm1445_vm9 = vmmov %vm1444_vm8 }
 0x17d   : > { %v527_v43 = vpop.f32.mrb[0].mxu0 }
 0x17e   : > { %v574_v44 = vmul.f32 %v1339_v41, %v527_v43  ;;  %v529_v45 = vpop.f32.mrb[1].mxu0 }
 0x17f   : > { %v575_v46 = vmul.f32 %v1342_v42, %v529_v45  ;;  %v531_v47 = vpop.f32.mrb[2].mxu0 }
 0x180   : > { %v532_v48 = vpop.f32.mrb[3].mxu0 }
 0x181   : > { %v577_v50 = vadd.f32 %v575_v46, %v574_v44 }
 0x182   : > { %v568_v51 = vpop.f32.mrb[0].mxu1 }
 0x183   : > { %v576_v52 = vmul.f32 %v1347_v49, %v568_v51  ;;  %v1141_v53 = vpop.f32.mrb[1].mxu1 }
 0x184   : > { %v571_v54 = vpop.f32.mrb[2].mxu1 }
 0x185   : > { %v1142_v55 = vpop.f32.mrb[3].mxu1  ;;  %v578_v56 = vadd.f32 %v577_v50, %v576_v52 }
 0x187   : > { %579 = vadd.xlane.f32.xlu0 %v578_v56 }
 0x214   : > { %v580_v57 = vpop.xlane.xlu0 %579 }
 0x215   : > { %v581_v58 = vmul.f32 0.00390625, %v580_v57 }
 0x217   : > { %v582_v59 = vsub.f32 %v527_v43, %v581_v58  ;;  %v583_v60 = vsub.f32 %v529_v45, %v581_v58  ;;  %v584_v61 = vsub.f32 %v568_v51, %v581_v58 }
 0x219   : > { %v585_v62 = vmul.f32 %v1339_v41, %v582_v59  ;;  %v586_v63 = vmul.f32 %v1342_v42, %v583_v60  ;;  %v587_v0 = vmul.f32 %v1347_v49, %v584_v61 }
 0x21b   : > { %v588_v1 = vmul.f32 %v585_v62, %v585_v62  ;;  %v589_v2 = vmul.f32 %v586_v63, %v586_v63  ;;  %v590_v5 = vmul.f32 %v587_v0, %v587_v0 }
 0x21d   : > { %v591_v6 = vadd.f32 %v589_v2, %v588_v1 }
 0x21f   : > { %v592_v7 = vadd.f32 %v591_v6, %v590_v5 }
 0x221   : > { %593 = vadd.xlane.f32.xlu1 %v592_v7 }
 0x2ae   : > { %v594_v8 = vpop.xlane.xlu1 %593 }
 0x2af   : > { %v595_v9 = vmul.f32 0.00390625, %v594_v8 }
 0x2b1   : > { %v596_v10 = vadd.f32 1e-05, %v595_v9 }
 0x2b3   : > { %1194 = vrsqrt.f32 %v596_v10 }
 0x2bd   : > { %v1195_v11 = vpop.eup %1194 }
 0x2be   : > { %v600_v12 = vmul.f32 %v1195_v11, %v584_v61  ;;  %v598_v13 = vmul.f32 %v1195_v11, %v582_v59  ;;  %v599_v14 = vmul.f32 %v1195_v11, %v583_v60 }
 0x2c0   : > { %vm603_vm4 = vcmp.gt.f32.partialorder %v600_v12, 0.0  ;;  %v606_v15 = vmul.f32 0.01, %v600_v12  ;;  %vm601_vm5 = vcmp.gt.f32.partialorder %v598_v13, 0.0  ;;  %vm602_vm6 = vcmp.gt.f32.partialorder %v599_v14, 0.0 }
 0x2c1   : > { %v604_v16 = vmul.f32 0.01, %v598_v13  ;;  %v605_v17 = vmul.f32 0.01, %v599_v14 }
 0x2c2   : > { %v609_v18 = vsel %vm603_vm4, %v600_v12, %v606_v15  ;;  %vm1440_vm4 = vcmask 752640  }
 0x2c3   : > { %v612_v19 = vmul.f32 %v1347_v49, %v609_v18  ;;  %v607_v20 = vsel %vm601_vm5, %v598_v13, %v604_v16  ;;  %v608_v21 = vsel %vm602_vm6, %v599_v14, %v605_v17  ;;  %vm1441_vm5 = vmmov %vm1440_vm4  ;;  %vm1442_vm6 = vcmask 744448  }
 0x2c4   : > { %v610_v22 = vmul.f32 %v1339_v41, %v607_v20  ;;  %v611_v23 = vmul.f32 %v1342_v42, %v608_v21  ;;  %vm1443_vm7 = vmmov %vm1442_vm6 }
 0x2c5   : > { %v1116_v24 = vpack.c.bf16 %v612_v19, %v612_v19 }
 0x2c6   : > { %v1115_v4 = vpack.c.bf16 %v611_v23, %v610_v22 }
 0x2c7   : > { %628 = vrot.lane.b32.xlu1 %v1116_v24, %s1217_s28 }
 0x2c8   : > { %626 = vrot.lane.b32.xlu0 %v1115_v4, %s1217_s28 }
 0x339   : > { %v629_v25 = vpop.permute.xlu1 %628 }
 0x33a   : > { %v631_v26 = vrot.slane %v629_v25, 4  ;;  %v627_v27 = vpop.permute.xlu0 %626 }
 0x33b   : > { %v630_v28 = vrot.slane %v627_v27, 4 }
 0x33d   : > { %v633_v29 = vsel %vm632_vm10, %v630_v28, %v627_v27  ;;  %v634_v30 = vsel %vm253_vm1, %v630_v28, %v631_v26 }
 0x33e   : > { %v635_v31 = vsel %vm632_vm10, %v634_v30, %v629_v25  ;;  %641 = vst.msk [vmem:[#allocation3] sm:$0xff] %vm640_vm12, %v633_v29  ;;  %vm1446_vm10 = vcmask 588800  }
 0x33f   : > { %644 = vst.msk [vmem:[#allocation3 + $0x8] sm:$0xff] %vm643_vm13, %v635_v31  ;;  %vm1447_vm12 = vmmov %vm1446_vm10 }
 0x345   : > { %v645_v32 = vld [vmem:[#allocation3] sm:$0xff] }
 0x346   : > { %v646_v33 = vld [vmem:[#allocation3 + $0x8] sm:$0xf]  ;;  %653 = vrot.lane.b32.xlu0 %v645_v32, %s1207_s19 }
 0x347   : > { %v650_v34 = vld [vmem:[#allocation3 + $0x8] sm:$0xff]  ;;  %648 = vst [vmem:[#allocation2 + $0x8] sm:$0xf] %v646_v33 }
 0x348   : > { %655 = vrot.lane.b32.xlu1 %v650_v34, %s1207_s19 }
 0x34a   : > { %670 = vrot.lane.b32.xlu0 %v645_v32, %s1206_s18 }
 0x34c   : > { %672 = vrot.lane.b32.xlu1 %v650_v34, %s1206_s18 }
 0x34e   : > { %687 = vrot.lane.b32.xlu0 %v645_v32, %s1209_s20 }
 0x350   : > { %689 = vrot.lane.b32.xlu1 %v650_v34, %s1209_s20 }
 0x352   : > { %704 = vrot.lane.b32.xlu0 %v645_v32, %s1210_s21 }
 0x354   : > { %706 = vrot.lane.b32.xlu1 %v650_v34, %s1210_s21 }
 0x356   : > { %721 = vrot.lane.b32.xlu0 %v645_v32, %s1211_s22 }
 0x358   : > { %723 = vrot.lane.b32.xlu1 %v650_v34, %s1211_s22 }
 0x35a   : > { %738 = vrot.lane.b32.xlu0 %v645_v32, %s1212_s23 }
 0x35c   : > { %740 = vrot.lane.b32.xlu1 %v650_v34, %s1212_s23 }
 0x35e   : > { %755 = vrot.lane.b32.xlu0 %v645_v32, %s1213_s24 }
 0x360   : > { %757 = vrot.lane.b32.xlu1 %v650_v34, %s1213_s24 }
 0x362   : > { %772 = vrot.lane.b32.xlu0 %v645_v32, %s1215_s25 }
 0x364   : > { %774 = vrot.lane.b32.xlu1 %v650_v34, %s1215_s25 }
 0x3b8   : > { %v654_v35 = vpop.permute.xlu0 %653 }
 0x3b9   : > { %v657_v36 = vrot.slane %v654_v35, 4 }
 0x3ba   : > { %v656_v37 = vpop.permute.xlu1 %655 }
 0x3bb   : > { %v658_v38 = vrot.slane %v656_v37, 4 }
 0x3bc   : > { %v671_v43 = vpop.permute.xlu0 %670 }
 0x3bd   : > { %v659_v39 = vsel %vm253_vm1, %v657_v36, %v658_v38  ;;  %v661_v40 = vsel %vm255_vm3, %v656_v37, %v658_v38  ;;  %v674_v45 = vrot.slane %v671_v43, 4 }
 0x3be   : > { %v660_v44 = vsel %vm255_vm3, %v654_v35, %v659_v39  ;;  %665 = vst [vmem:[#allocation2 + $0x14] sm:$0xf] %v661_v40  ;;  %v673_v46 = vpop.permute.xlu1 %672  ;;  %vm1434_vm3 = vcmask 900096  }
 0x3bf   : > { %v675_v47 = vrot.slane %v673_v46, 4  ;;  %v1094_v48 = vcombine.low %v645_v32, %v660_v44  ;;  %v1095_v50 = vcombine.high %v645_v32, %v660_v44  ;;  %vm1435_vm14 = vmmov %vm1434_vm3 }
 0x3c0   : > { %v688_v53 = vpop.permute.xlu0 %687 }
 0x3c1   : > { %v676_v51 = vsel %vm253_vm1, %v674_v45, %v675_v47  ;;  %v678_v52 = vsel %vm273_vm2, %v673_v46, %v675_v47  ;;  %888 = vmatprep.subr.bf16.mxu0 %v1095_v50  ;;  %v691_v55 = vrot.slane %v688_v53, 4 }
 0x3c2   : > { %v677_v54 = vsel %vm273_vm2, %v671_v43, %v676_v51  ;;  %682 = vst [vmem:[#allocation2 + $0x20] sm:$0xf] %v678_v52  ;;  %v690_v56 = vpop.permute.xlu1 %689  ;;  %889 = vmatpush1.bf16.msra.mxu0 %v1094_v48  ;;  %vm1436_vm2 = vcmask 891904   ;;  %v785_v48 = vld [vmem:[%s1425_s2] sm:$0xf] }
 0x3c3   : > { %v692_v57 = vrot.slane %v690_v56, 4  ;;  %vm1437_vm15 = vmmov %vm1436_vm2 }
 0x3c4   : > { %v705_v60 = vpop.permute.xlu0 %704 }
 0x3c5   : > { %v693_v58 = vsel %vm253_vm1, %v691_v55, %v692_v57  ;;  %v695_v59 = vsel %vm1434_vm3, %v690_v56, %v692_v57  ;;  %v1189_v61 = vld [vmem:[#allocation2 + $0x8] ss:$12 sps:$4 sm:$0xff]   ;;  %v708_v63 = vrot.slane %v705_v60, 4 }
 0x3c6   : > { %v694_v62 = vsel %vm1435_vm14, %v688_v53, %v693_v58  ;;  %699 = vst [vmem:[#allocation2 + $0x2c] sm:$0xf] %v695_v59  ;;  %v707_v0 = vpop.permute.xlu1 %706  ;;  %1144 = vmatpush3.bf16.msra.mxu1 %v1189_v61 }
 0x3c7   : > { %v709_v1 = vrot.slane %v707_v0, 4  ;;  %v1097_v2 = vcombine.low %v677_v54, %v694_v62  ;;  %v1098_v5 = vcombine.high %v677_v54, %v694_v62  ;;  %1145 = vmatprep.subr.bf16.mxu1 %v1208_v3 }
 0x3c8   : > { %v722_v8 = vpop.permute.xlu0 %721 }
 0x3c9   : > { %v710_v6 = vsel %vm253_vm1, %v708_v63, %v709_v1  ;;  %v712_v7 = vsel %vm1436_vm2, %v707_v0, %v709_v1  ;;  %890 = vmatprep.subr.bf16.mxu0 %v1098_v5  ;;  %v725_v10 = vrot.slane %v722_v8, 4 }
 0x3ca   : > { %v711_v9 = vsel %vm1437_vm15, %v705_v60, %v710_v6  ;;  %716 = vst [vmem:[#allocation2 + $0x38] sm:$0xf] %v712_v7  ;;  %v724_v11 = vpop.permute.xlu1 %723  ;;  %891 = vmatpush1.bf16.msra.mxu0 %v1097_v2 }
 0x3cb   : > { %v726_v12 = vrot.slane %v724_v11, 4 }
 0x3cc   : > { %v739_v15 = vpop.permute.xlu0 %738 }
 0x3cd   : > { %v727_v13 = vsel %vm253_vm1, %v725_v10, %v726_v12  ;;  %v729_v14 = vsel %vm1438_vm0, %v724_v11, %v726_v12  ;;  %v1190_v16 = vld [vmem:[#allocation2 + $0x20] ss:$12 sps:$4 sm:$0xff]   ;;  %v742_v18 = vrot.slane %v739_v15, 4 }
 0x3ce   : > { %v728_v17 = vsel %vm1439_vm11, %v722_v8, %v727_v13  ;;  %733 = vst [vmem:[#allocation2 + $0x44] sm:$0xf] %v729_v14  ;;  %v741_v19 = vpop.permute.xlu1 %740  ;;  %1146 = vmatpush3.bf16.msra.mxu1 %v1190_v16 }
 0x3cf   : > { %v743_v20 = vrot.slane %v741_v19, 4  ;;  %v1100_v21 = vcombine.low %v711_v9, %v728_v17  ;;  %v1101_v22 = vcombine.high %v711_v9, %v728_v17  ;;  %1147 = vmatprep.subr.bf16.mxu1 %v1208_v3 }
 0x3d0   : > { %v756_v4 = vpop.permute.xlu0 %755 }
 0x3d1   : > { %v744_v23 = vsel %vm253_vm1, %v742_v18, %v743_v20  ;;  %v746_v24 = vsel %vm1440_vm4, %v741_v19, %v743_v20  ;;  %892 = vmatprep.subr.bf16.mxu0 %v1101_v22  ;;  %v759_v26 = vrot.slane %v756_v4, 4 }
 0x3d2   : > { %v745_v25 = vsel %vm1441_vm5, %v739_v15, %v744_v23  ;;  %750 = vst [vmem:[#allocation2 + $0x50] sm:$0xf] %v746_v24  ;;  %v758_v27 = vpop.permute.xlu1 %757  ;;  %893 = vmatpush1.bf16.msra.mxu0 %v1100_v21 }
 0x3d3   : > { %v760_v28 = vrot.slane %v758_v27, 4 }
 0x3d4   : > { %v773_v31 = vpop.permute.xlu0 %772 }
 0x3d5   : > { %v761_v29 = vsel %vm253_vm1, %v759_v26, %v760_v28  ;;  %v763_v30 = vsel %vm1442_vm6, %v758_v27, %v760_v28  ;;  %v1191_v32 = vld [vmem:[#allocation2 + $0x38] ss:$12 sps:$4 sm:$0xff]   ;;  %v776_v34 = vrot.slane %v773_v31, 4 }
 0x3d6   : > { %v762_v33 = vsel %vm1443_vm7, %v756_v4, %v761_v29  ;;  %767 = vst [vmem:[#allocation2 + $0x5c] sm:$0xf] %v763_v30  ;;  %v775_v35 = vpop.permute.xlu1 %774  ;;  %1148 = vmatpush3.bf16.msra.mxu1 %v1191_v32 }
 0x3d7   : > { %v777_v36 = vrot.slane %v775_v35, 4  ;;  %v1103_v37 = vcombine.low %v745_v25, %v762_v33  ;;  %v1104_v38 = vcombine.high %v745_v25, %v762_v33  ;;  %1149 = vmatprep.subr.bf16.mxu1 %v1208_v3 }
 0x3d9   : > { %v778_v39 = vsel %vm253_vm1, %v776_v34, %v777_v36  ;;  %v780_v40 = vsel %vm1444_vm8, %v775_v35, %v777_v36  ;;  %894 = vmatprep.subr.bf16.mxu0 %v1104_v38 }
 0x3da   : > { %v779_v43 = vsel %vm1445_vm9, %v773_v31, %v778_v39  ;;  %784 = vst [vmem:[#allocation2 + $0x68] sm:$0xf] %v780_v40  ;;  %895 = vmatpush1.bf16.msra.mxu0 %v1103_v37 }
 0x3db   : > { %v1107_v44 = vcombine.high %v779_v43, %v779_v43  ;;  %v1106_v45 = vcombine.low %v779_v43, %v779_v43 }
 0x3dd   : > { %v1192_v46 = vld [vmem:[#allocation2 + $0x50] ss:$12 sps:$4 sm:$0xff]   ;;  %1109 = vmatprep.subr.msk.bf16.mxu0 %vm253_vm1, %v1107_v44  ;;  %v880_v47 = vsel %vm253_vm1, %v1106_v45, 0 }
 0x3de   : > { %897 = vmatpush1.bf16.msra.mxu0 %v880_v47  ;;  %1150 = vmatpush3.bf16.msra.mxu1 %v1192_v46 }
 0x3df   : > { %1151 = vmatprep.subr.bf16.mxu1 %v1208_v3 }
 0x3e1   : > { %v1193_v50 = vld [vmem:[#allocation2 + $0x68] ss:$0 sps:$4 sm:$0xff]   ;;  %1110 = vmatmul.mubr.msk.bf16.vlgmr.msra.gmra.mrb[4].mxu0 %vm1446_vm10, %v785_v48 }
 0x3e2   : > { %v886_v51 = vsel %vm253_vm1, %v1193_v50, 0 }
 0x3e3   : > { %1152 = vmatpush3.bf16.msra.mxu1 %v886_v51 }
 0x3e6   : > { %1154 = vmatmul.mubr.msk.bf16.vlgmr.msra.gmra.mrb[4].mxu1 %vm1447_vm12, %v785_v48 }
 0x4b4   : > { %v922_v52 = vpop.f32.mrb[4].mxu0 }
 0x4b5   : > { %v969_v53 = vmul.f32 %v1339_v41, %v922_v52  ;;  %v924_v54 = vpop.f32.mrb[5].mxu0 }
 0x4b6   : > { %v970_v55 = vmul.f32 %v1342_v42, %v924_v54  ;;  %v926_v56 = vpop.f32.mrb[6].mxu0 }
 0x4b7   : > { %v927_v57 = vpop.f32.mrb[7].mxu0 }
 0x4b8   : > { %v972_v58 = vadd.f32 %v970_v55, %v969_v53 }
 0x4b9   : > { %v963_v59 = vpop.f32.mrb[4].mxu1 }
 0x4ba   : > { %v971_v3 = vmul.f32 %v1347_v49, %v963_v59  ;;  %v1155_v60 = vpop.f32.mrb[5].mxu1 }
 0x4bb   : > { %v966_v61 = vpop.f32.mrb[6].mxu1 }
 0x4bc   : > { %v1156_v62 = vpop.f32.mrb[7].mxu1  ;;  %v973_v63 = vadd.f32 %v972_v58, %v971_v3 }
 0x4be   : > { %974 = vadd.xlane.f32.xlu0 %v973_v63 }
 0x54b   : > { %v975_v0 = vpop.xlane.xlu0 %974 }
 0x54c   : > { %v976_v1 = vmul.f32 0.00390625, %v975_v0 }
 0x54e   : > { %v977_v2 = vsub.f32 %v922_v52, %v976_v1  ;;  %v978_v5 = vsub.f32 %v924_v54, %v976_v1  ;;  %v979_v6 = vsub.f32 %v963_v59, %v976_v1 }
 0x550   : > { %v980_v7 = vmul.f32 %v1339_v41, %v977_v2  ;;  %v981_v8 = vmul.f32 %v1342_v42, %v978_v5  ;;  %v982_v9 = vmul.f32 %v1347_v49, %v979_v6 }
 0x552   : > { %v983_v10 = vmul.f32 %v980_v7, %v980_v7  ;;  %v984_v11 = vmul.f32 %v981_v8, %v981_v8  ;;  %v985_v12 = vmul.f32 %v982_v9, %v982_v9 }
 0x554   : > { %v986_v13 = vadd.f32 %v984_v11, %v983_v10 }
 0x556   : > { %v987_v14 = vadd.f32 %v986_v13, %v985_v12 }
 0x558   : > { %988 = vadd.xlane.f32.xlu1 %v987_v14 }
 0x5e5   : > { %v989_v15 = vpop.xlane.xlu1 %988 }
 0x5e6   : > { %v990_v16 = vmul.f32 0.00390625, %v989_v15 }
 0x5e8   : > { %v991_v17 = vadd.f32 1e-05, %v990_v16 }
 0x5ea   : > { %1196 = vrsqrt.f32 %v991_v17 }
 0x5f4   : > { %v1197_v18 = vpop.eup %1196 }
 0x5f5   : > { %v993_v19 = vmul.f32 %v1197_v18, %v977_v2  ;;  %v994_v20 = vmul.f32 %v1197_v18, %v978_v5  ;;  %v995_v21 = vmul.f32 %v1197_v18, %v979_v6 }
 0x5f7   : > { %vm996_vm1 = vcmp.gt.f32.partialorder %v993_v19, 0.0  ;;  %vm997_vm13 = vcmp.gt.f32.partialorder %v994_v20, 0.0  ;;  %vm998_vm3 = vcmp.gt.f32.partialorder %v995_v21, 0.0  ;;  %v999_v41 = vmul.f32 0.01, %v993_v19 }
 0x5f8   : > { %v1000_v42 = vmul.f32 0.01, %v994_v20  ;;  %v1001_v49 = vmul.f32 0.01, %v995_v21 }
 0x5f9   : > { %v1002_v22 = vsel %vm996_vm1, %v993_v19, %v999_v41 }
 0x5fa   : > { %v1003_v23 = vsel %vm997_vm13, %v994_v20, %v1000_v42  ;;  %v1004_v24 = vsel %vm998_vm3, %v995_v21, %v1001_v49  ;;  %1005 = vst [vmem:[%s170_s7] sm:$0xff] %v1002_v22 }
 0x5fb   : > { %1006 = vst [vmem:[%s170_s7 + $0x8] sm:$0xff] %v1003_v23  ;;  %1007 = vst [vmem:[%s170_s7 + $0x10] sm:$0xff] %v1004_v24 }
 0x5fc PF: > { %s13_s12 = sadd.s32 1, %s1204_s12  }
 0x5fd   : > { %p10_p4 = scmp.ge.s32.totalorder %s13_s12, 4  }
 0x5ff   :  { %12 = sbr.rel (!%p10_p4) target bundleno = 1 (0x1), region = 62 }

</bundles_post_ra>
